<compile_context>
chip_gen: v6e
topology: v6e:2x2x1
jax: 0.10.0
libtpu: 0.0.40
codegen_flags: <defaults>
</compile_context>

<pallas_src>
import functools

import jax
import jax.numpy as jnp
from jax import lax
from jax.experimental import pallas as pl
from jax.experimental.pallas import tpu as pltpu


_LANES = 128
_SUBLANES = 8


def _round_up(x, m):
    return ((x + m - 1) // m) * m


def _vmem_capacity_bytes():
    """Physical per-core VMEM; conservative (v7x-sized) fallback."""
    try:
        return int(pltpu.get_tpu_info().vmem_capacity_bytes)
    except Exception:
        return 64 * 1024 * 1024


def _cores_per_chip():
    """TensorCores sharing one JAX device (megacore v4/v5p, dual-TC v7x)."""
    try:
        kind = (getattr(jax.devices()[0], "device_kind", "") or "").lower()
        if any(s in kind for s in ("v4", "v5p", "v7")):
            return 2
    except Exception:
        pass
    return 1


def _choose_tile_n(c, itemsize_x, itemsize_t, focal, vmem_limit):
    """Largest row tile whose working set fits a fraction of the VMEM limit."""
    c_vmem = _round_up(c, _LANES)              # physical lane padding in VMEM
    n_temps = 6 if focal else 4                # live full-tile f32 temporaries
    # double-buffered inputs (both dtypes) + f32 temporaries
    per_row = c_vmem * (2 * (itemsize_x + itemsize_t) + 4 * n_temps)
    budget = (vmem_limit * 3) // 4
    cap = 512 if vmem_limit <= 40 * 1024 * 1024 else 1024
    tile_n = budget // per_row
    return int(max(_SUBLANES, min(cap, (tile_n // _SUBLANES) * _SUBLANES)))


def _mce_kernel(x_ref, t_ref, o_ref, *, focal, tile_n, tiles_per_split, n_rows):
    i = pl.program_id(1)

    # The output block (p, 0, 0) is resident across the whole i-sweep: use it
    # directly as the (lane-dense) accumulator -- no scratch needed.
    @pl.when(i == 0)
    def _():
        o_ref[...] = jnp.zeros_like(o_ref)

    x = x_ref[...].astype(jnp.float32)     # (TN, C) logits
    t = t_ref[...].astype(jnp.float32)     # (TN, C) soft targets

    # Per-row target mass.  Its reciprocal is applied to per-row sums only
    # (never a full-tile multiply).
    t_sum = jnp.sum(t, axis=1, keepdims=True)                # (TN, 1)
    t_div = jnp.where(t_sum != 0.0, t_sum, 1.0)

    # Numerically-stable softmax statistics.
    m = jnp.max(x, axis=1, keepdims=True)
    shifted = x - m
    e = jnp.exp(shifted)
    s = jnp.sum(e, axis=1, keepdims=True)
    log_s = jnp.log(s)                                        # (TN, 1)

    if focal:
        # -sum_c (t/td)*(1-p)^2*log_p == (w_sum*log_s - sum_c w*shifted)/td,
        # with w = t*(1-p)^2; avoids materializing log_p (full-tile subtract)
        # and the full-tile target normalization.
        p = e * (1.0 / s)                                     # reuses exp(shifted)
        w = t * (1.0 - p) ** 2
        w_sum = jnp.sum(w, axis=1, keepdims=True)
        dot_ws = jnp.sum(w * shifted, axis=1, keepdims=True)
        row_loss = (w_sum * log_s - dot_ws) / t_div
    else:
        # -sum_c (t/td)*log_p == (t_sum*log_s - sum_c t*shifted)/td
        dot_ts = jnp.sum(t * shifted, axis=1, keepdims=True)
        row_loss = (t_sum * log_s - dot_ts) / t_div

    # Rows past the real batch (partial last block, or a duplicated block on
    # the short split) carry undefined data; a per-row select keeps them out
    # of the sum.  This is (TN, 1)-shaped work only -- never a full tile.
    tile_idx = pl.program_id(0) * tiles_per_split + i
    row_ids = lax.broadcasted_iota(jnp.int32, (tile_n, 1), 0)
    valid = (tile_idx * tile_n + row_ids) < n_rows
    row_loss = jnp.where(valid, row_loss, 0.0)

    o_ref[...] += jnp.sum(row_loss)


def multi_cross_entropy_loss(logits, target, *, focal=False, tile_n=None):
    """logits, target: (N, C) (f32 or bf16). Returns scalar mean loss (f32)."""
    n, c = logits.shape
    assert target.shape == (n, c)

    vmem_cap = _vmem_capacity_bytes()
    vmem_limit = int(min(vmem_cap // 2, 64 * 1024 * 1024))

    itemsize_x = jnp.dtype(logits.dtype).itemsize
    itemsize_t = jnp.dtype(target.dtype).itemsize
    if tile_n is None:
        tile_n = _choose_tile_n(c, itemsize_x, itemsize_t, focal, vmem_limit)
    tile_n = max(_SUBLANES, (int(tile_n) // _SUBLANES) * _SUBLANES)
    if tile_n >= n:
        tile_n = n                 # single block == full array dim (always legal)

    total_tiles = -(-n // tile_n)
    num_splits = 2 if (_cores_per_chip() >= 2 and total_tiles >= 2) else 1
    tiles_per_split = -(-total_tiles // num_splits)

    if num_splits * tiles_per_split == total_tiles:
        row_map = lambda p, i: (p * tiles_per_split + i, 0)
    else:
        # Short split: clamp the DMA to the last real tile; the in-kernel row
        # mask zeroes the duplicated tile's contribution.
        last = total_tiles - 1
        row_map = lambda p, i: (jnp.minimum(p * tiles_per_split + i, last), 0)

    kernel = functools.partial(
        _mce_kernel, focal=focal, tile_n=tile_n,
        tiles_per_split=tiles_per_split, n_rows=n)

    partials = pl.pallas_call(
        kernel,
        out_shape=jax.ShapeDtypeStruct((num_splits, 1, _LANES), jnp.float32),
        grid_spec=pltpu.PrefetchScalarGridSpec(
            num_scalar_prefetch=0,
            grid=(num_splits, tiles_per_split),
            in_specs=[
                pl.BlockSpec((tile_n, c), row_map),   # full C: no lane pad copy
                pl.BlockSpec((tile_n, c), row_map),
            ],
            out_specs=pl.BlockSpec((1, 1, _LANES), lambda p, i: (p, 0, 0)),
        ),
        compiler_params=pltpu.CompilerParams(
            dimension_semantics=("parallel", "arbitrary"),
            vmem_limit_bytes=vmem_limit,
        ),
    )(logits, target)

    # Unscaled per-split sums -> mean over the real batch size, applied once.
    return (jnp.sum(partials[:, 0, 0]) / n).astype(jnp.float32)


def _reference(logits, target, focal=False):
    logits = logits.astype(jnp.float32)
    target = target.astype(jnp.float32)
    t_sum = jnp.sum(target, axis=1, keepdims=True)
    t_div = jnp.where(t_sum != 0, t_sum, jnp.ones_like(t_sum))
    t = target / t_div
    log_p = jax.nn.log_softmax(logits, axis=1)
    if focal:
        p = jax.nn.softmax(logits, axis=1)
        out = jnp.sum(-t * (1.0 - p) ** 2 * log_p, axis=1)
    else:
        out = jnp.sum(-t * log_p, axis=1)
    return jnp.mean(out)


if __name__ == "__main__":
    key = jax.random.PRNGKey(0)
    k1, k2, k3, k4, k5, k6 = jax.random.split(key, 6)

    # Case 1: small canonical case (C=32 -> full-dim lane block, single tile).
    N, C = 16, 32
    logits = jax.random.normal(k1, (N, C), dtype=jnp.float32)
    target = jax.random.uniform(k2, (N, C), dtype=jnp.float32)
    target = target.at[0].set(0.0).at[5].set(0.0)   # all-zero target rows

    for focal in (False, True):
        loss = multi_cross_entropy_loss(logits, target, focal=focal)
        jax.block_until_ready(loss)
        ref = _reference(logits, target, focal=focal)
        assert jnp.allclose(loss, ref, rtol=1e-3, atol=1e-3), (focal, loss, ref)

    # Case 2: N not divisible by the tile -> partial last block + row mask;
    # tile_n=96 gives an odd tile count (exercises the clamped split on 2-TC parts).
    N2, C2 = 200, 96
    logits2 = jax.random.normal(k3, (N2, C2), dtype=jnp.float32)
    target2 = jax.random.uniform(k4, (N2, C2), dtype=jnp.float32)
    target2 = target2.at[7].set(0.0)

    for tile in (64, 96):
        for focal in (False, True):
            loss2 = multi_cross_entropy_loss(logits2, target2, focal=focal,
                                             tile_n=tile)
            jax.block_until_ready(loss2)
            ref2 = _reference(logits2, target2, focal=focal)
            assert jnp.allclose(loss2, ref2, rtol=1e-3, atol=1e-3), (
                tile, focal, loss2, ref2)

    # Case 3: bf16 logits + f32 targets, N not a multiple of 8, C > 128 and
    # not lane-aligned -- no padding copies anywhere.
    N3, C3 = 53, 130
    logits3 = jax.random.normal(k5, (N3, C3), dtype=jnp.bfloat16)
    target3 = jax.random.uniform(k6, (N3, C3), dtype=jnp.float32)
    target3 = target3.at[3].set(0.0)

    for focal in (False, True):
        loss3 = multi_cross_entropy_loss(logits3, target3, focal=focal,
                                         tile_n=16)
        jax.block_until_ready(loss3)
        ref3 = _reference(logits3, target3, focal=focal)
        assert jnp.allclose(loss3, ref3, rtol=1e-3, atol=1e-3), (focal, loss3, ref3)

    print("KERNEL_OK")
</pallas_src>

<mosaic_0001>
module attributes {stable_mosaic.version = 11 : i64} {
  func.func @_mce_kernel(%arg0: i32, %arg1: i32, %arg2: memref<16x32xf32, #tpu.memory_space<vmem>>, %arg3: memref<16x32xf32, #tpu.memory_space<vmem>>, %arg4: memref<1x1x128xf32, #tpu.memory_space<vmem>>) attributes {dimension_semantics = [#tpu.dimension_semantics<parallel>, #tpu.dimension_semantics<arbitrary>], iteration_bounds = array<i64: 1, 1>, scalar_prefetch = 0 : i64, scratch_operands = 0 : i64, tpu.core_type = #tpu.core_type<tc>, window_params = [{transform_indices = @transform_0, window_bounds = array<i64: 16, 32>}, {transform_indices = @transform_1, window_bounds = array<i64: 16, 32>}, {transform_indices = @transform_2, window_bounds = array<i64: 1, 1, 128>}]} {
    %c0_i32 = arith.constant 0 : i32
    %0 = arith.cmpi eq, %arg1, %c0_i32 : i32
    %1 = arith.extui %0 : i1 to i32
    %c0_i32_0 = arith.constant 0 : i32
    %2 = arith.cmpi ne, %1, %c0_i32_0 : i32
    scf.if %2 {
      %cst_18 = arith.constant 0.000000e+00 : f32
      %43 = vector.broadcast %cst_18 : f32 to vector<1x1x128xf32>
      %c0_19 = arith.constant 0 : index
      %c0_20 = arith.constant 0 : index
      %c0_21 = arith.constant 0 : index
      %44 = vector.load %arg4[%c0_19, %c0_20, %c0_21] : memref<1x1x128xf32, #tpu.memory_space<vmem>>, vector<1x1x128xf32>
      tpu.vector_store %arg4[%c0_19, %c0_20, %c0_21], %43 {strides = array<i32>} : memref<1x1x128xf32, #tpu.memory_space<vmem>>, vector<1x1x128xf32>,
    } else {
    }
    %c0 = arith.constant 0 : index
    %c0_1 = arith.constant 0 : index
    %3 = vector.load %arg2[%c0, %c0_1] : memref<16x32xf32, #tpu.memory_space<vmem>>, vector<16x32xf32>
    %c0_2 = arith.constant 0 : index
    %c0_3 = arith.constant 0 : index
    %4 = vector.load %arg3[%c0_2, %c0_3] : memref<16x32xf32, #tpu.memory_space<vmem>>, vector<16x32xf32>
    %cst = arith.constant dense<0.000000e+00> : vector<16xf32>
    %5 = vector.multi_reduction <add>, %4, %cst [1] : vector<16x32xf32> to vector<16xf32>
    %6 = vector.shape_cast %5 : vector<16xf32> to vector<16x1xf32>
    %cst_4 = arith.constant 0.000000e+00 : f32
    %7 = vector.broadcast %cst_4 : f32 to vector<16x1xf32>
    %8 = arith.cmpf one, %6, %7 : vector<16x1xf32>
    %cst_5 = arith.constant 1.000000e+00 : f32
    %9 = vector.broadcast %cst_5 : f32 to vector<16x1xf32>
    %10 = arith.select %8, %6, %9 : vector<16x1xi1>, vector<16x1xf32>
    %cst_6 = arith.constant dense<0xFF800000> : vector<16xf32>
    %11 = vector.multi_reduction <maximumf>, %3, %cst_6 [1] : vector<16x32xf32> to vector<16xf32>
    %12 = vector.shape_cast %11 : vector<16xf32> to vector<16x1xf32>
    %13 = vector.broadcast %12 : vector<16x1xf32> to vector<16x32xf32>
    %14 = arith.subf %3, %13 : vector<16x32xf32>
    %15 = math.exp %14 : vector<16x32xf32>
    %cst_7 = arith.constant dense<0.000000e+00> : vector<16xf32>
    %16 = vector.multi_reduction <add>, %15, %cst_7 [1] : vector<16x32xf32> to vector<16xf32>
    %17 = vector.shape_cast %16 : vector<16xf32> to vector<16x1xf32>
    %18 = math.log %17 : vector<16x1xf32>
    %19 = arith.mulf %4, %14 : vector<16x32xf32>
    %cst_8 = arith.constant dense<0.000000e+00> : vector<16xf32>
    %20 = vector.multi_reduction <add>, %19, %cst_8 [1] : vector<16x32xf32> to vector<16xf32>
    %21 = vector.shape_cast %20 : vector<16xf32> to vector<16x1xf32>
    %22 = arith.mulf %6, %18 : vector<16x1xf32>
    %23 = arith.subf %22, %21 : vector<16x1xf32>
    %24 = arith.divf %23, %10 : vector<16x1xf32>
    %c1_i32 = arith.constant 1 : i32
    %25 = arith.muli %arg0, %c1_i32 : i32
    %26 = arith.addi %25, %arg1 : i32
    %27 = tpu.iota {dimensions = array<i32: 0>} : vector<16x1xi32>
    %c16_i32 = arith.constant 16 : i32
    %28 = arith.muli %26, %c16_i32 : i32
    %29 = vector.broadcast %28 : i32 to vector<16x1xi32>
    %30 = arith.addi %29, %27 : vector<16x1xi32>
    %c16_i32_9 = arith.constant 16 : i32
    %31 = vector.broadcast %c16_i32_9 : i32 to vector<16x1xi32>
    %32 = arith.cmpi slt, %30, %31 : vector<16x1xi32>
    %cst_10 = arith.constant 0.000000e+00 : f32
    %33 = vector.broadcast %cst_10 : f32 to vector<16x1xf32>
    %34 = arith.select %32, %24, %33 : vector<16x1xi1>, vector<16x1xf32>
    %c0_11 = arith.constant 0 : index
    %c0_12 = arith.constant 0 : index
    %c0_13 = arith.constant 0 : index
    %35 = vector.load %arg4[%c0_11, %c0_12, %c0_13] : memref<1x1x128xf32, #tpu.memory_space<vmem>>, vector<1x1x128xf32>
    %36 = vector.shape_cast %34 : vector<16x1xf32> to vector<1x16x1xf32>
    %cst_14 = arith.constant dense<0.000000e+00> : vector<1xf32>
    %37 = vector.multi_reduction <add>, %36, %cst_14 [1, 2] : vector<1x16x1xf32> to vector<1xf32>
    %38 = vector.shape_cast %37 : vector<1xf32> to vector<1x1x1xf32>
    %39 = vector.extract %38[0, 0, 0] : f32 from vector<1x1x1xf32>
    %40 = vector.broadcast %39 : f32 to vector<1x1x128xf32>
    %41 = arith.addf %35, %40 : vector<1x1x128xf32>
    %c0_15 = arith.constant 0 : index
    %c0_16 = arith.constant 0 : index
    %c0_17 = arith.constant 0 : index
    %42 = vector.load %arg4[%c0_15, %c0_16, %c0_17] : memref<1x1x128xf32, #tpu.memory_space<vmem>>, vector<1x1x128xf32>
    tpu.vector_store %arg4[%c0_15, %c0_16, %c0_17], %41 {strides = array<i32>} : memref<1x1x128xf32, #tpu.memory_space<vmem>>, vector<1x1x128xf32>,
    return
  }
  func.func @transform_0(%arg0: i32, %arg1: i32) -> (i32, i32) {
    %c1_i32 = arith.constant 1 : i32
    %0 = arith.muli %arg0, %c1_i32 : i32
    %1 = arith.addi %0, %arg1 : i32
    %c0_i32 = arith.constant 0 : i32
    %c0_i32_0 = arith.constant 0 : i32
    return %1, %c0_i32 : i32, i32
  }
  func.func @transform_1(%arg0: i32, %arg1: i32) -> (i32, i32) {
    %c1_i32 = arith.constant 1 : i32
    %0 = arith.muli %arg0, %c1_i32 : i32
    %1 = arith.addi %0, %arg1 : i32
    %c0_i32 = arith.constant 0 : i32
    %c0_i32_0 = arith.constant 0 : i32
    return %1, %c0_i32 : i32, i32
  }
  func.func @transform_2(%arg0: i32, %arg1: i32) -> (i32, i32, i32) {
    %c0_i32 = arith.constant 0 : i32
    %c0_i32_0 = arith.constant 0 : i32
    %c0_i32_1 = arith.constant 0 : i32
    return %arg0, %c0_i32, %c0_i32_0 : i32, i32, i32
  }
}

</mosaic_0001>

<bundles_post_ra>
// kernel: tpu_custom_call.1
= control target key start
LH: loop header
LB: loop body
LE: loop exit
PB: predicated region body
PF: predicated region fallthrough
CT: control target
= control target key end

     0   :  { %7 = vsyncpa [#allocation3], 0  ;;  %s279_s0 = inlined_call_operand.hbm [shape: f32[16,32], index: 0, kind: input, shape index: {}]   ;;  %s280_s1 = inlined_call_operand.hbm [shape: f32[16,32], index: 1, kind: input, shape index: {}]   ;;  %s281_s2 = inlined_call_operand.hbm [shape: f32[1,1,128], index: 2, kind: output, shape index: {}]  }
   0x1   :  { %8 = vsyncpa [#allocation6], 0 }
   0x2   :  { %9 = vsyncpa [#allocation4], 0  ;;  %s241_s9 = smov [#allocation2]  }
   0x3   :  { %s19_s10 = sshll.u32 %s241_s9, 4  ;;  %s20_s10 = int_to_ptr.vmem [resolvable:$true] %s19_s10 }
   0x4   :  { %s183_s11 = scalar_lea.vmem %s20_s10, 256  ;;  %p188_p1 = scmp.lt.s32.totalorder %s20_s10, %s20_s10 }
   0x5   :  { %p184_p0 = scmp.ne.s32.totalorder %s20_s10, %s183_s11  ;;  %p189_p2 = scmp.lt.s32.totalorder %s183_s11, %s183_s11 }
   0x7   :  { %p190_p3 = por %p189_p2, %p188_p1 }
   0x9   :  { %p191_p4 = pnand %p190_p3, %p184_p0 }
   0xb   :  { %194 = shalt.err (!%p191_p4)
}
   0xc   :  { %s242_s12 = smov 128   ;;  %s243_s13 = smov 8  }
   0xd   :  { %25 = dma.hbm_to_vmem [thread:$0]  %s279_s0, 256, %s20_s10, [#allocation3], %s242_s12, %s242_s12, %s243_s13  }
   0xe   :  { %s244_s16 = smov [#allocation5]  }
   0xf   :  { %s35_s17 = sshll.u32 %s244_s16, 4  ;;  %s36_s17 = int_to_ptr.vmem [resolvable:$true] %s35_s17 }
  0x10   :  { %s203_s18 = scalar_lea.vmem %s36_s17, 256  ;;  %p208_p6 = scmp.lt.s32.totalorder %s36_s17, %s36_s17 }
  0x11   :  { %p204_p5 = scmp.ne.s32.totalorder %s36_s17, %s203_s18  ;;  %p209_p7 = scmp.lt.s32.totalorder %s203_s18, %s203_s18 }
  0x13   :  { %p210_p8 = por %p209_p7, %p208_p6 }
  0x15   :  { %p211_p9 = pnand %p210_p8, %p204_p5 }
  0x17   :  { %214 = shalt.err (!%p211_p9)
}
  0x18   :  { %41 = dma.hbm_to_vmem [thread:$0]  %s280_s1, 256, %s36_s17, [#allocation6], %s242_s12, %s242_s12, %s243_s13  }
  0x19   :  { %235 = dma.done.wait [#allocation3], 256  }
  0x1a   :  { %236 = vsyncadd [#allocation3], 4294967040 }
  0x1b   :  { %237 = dma.done.wait [#allocation6], 256  }
  0x1c   :  { %238 = vsyncadd [#allocation6], 4294967040  ;;  %v245_v0 = vmov 0.0   ;;  %vm61_vm0 = vcmask 261120   ;;  %v57_v1 = vld [vmem:[#allocation2] sm:$0xff]  ;;  %v58_v2 = vld [vmem:[#allocation2 + $0x8] sm:$0xff] }
  0x1d   :  { %56 = vst [vmem:[#allocation7] sm:$0x1] %v245_v0  ;;  %v72_v3 = vsel %vm61_vm0, %v57_v1, -inf  ;;  %v75_v4 = vsel %vm61_vm0, %v58_v2, -inf  ;;  %v59_v5 = vld [vmem:[#allocation5] sm:$0xff]  ;;  %v60_v19 = vld [vmem:[#allocation5 + $0x8] sm:$0xff] }
  0x1e   :  { %73 = vmax.xlane.f32.xlu0 %v72_v3  ;;  %v62_v6 = vsel %vm61_vm0, %v59_v5, 0.0  ;;  %v65_v20 = vsel %vm61_vm0, %v60_v19, 0.0  ;;  %vm123_vm3 = vcmask 7168   ;;  %s246_s0 = smov [#allocation7]  }
  0x1f   :  { %s145_s1 = sshll.u32 %s246_s0, 4  ;;  %s146_s1 = int_to_ptr.vmem [resolvable:$true] %s145_s1 }
  0x20   :  { %s215_s22 = scalar_lea.vmem %s146_s1, 16  ;;  %s219_s23 = scalar_lea.vmem %s146_s1, 32 }
  0x21   :  { %p216_p10 = scmp.ne.s32.totalorder %s146_s1, %s215_s22  ;;  %p220_p11 = scmp.lt.s32.totalorder %s146_s1, %s146_s1 }
  0x22   :  { %76 = vmax.xlane.f32.xlu0 %v75_v4  ;;  %p221_p12 = scmp.lt.s32.totalorder %s219_s23, %s215_s22 }
  0x24   :  { %v122_v53 = vld [vmem:[#allocation7] sm:$0x1]  ;;  %p222_p13 = por %p221_p12, %p220_p11 }
  0x26   :  { %63 = vadd.xlane.f32.xlu0 %v62_v6  ;;  %p223_p0 = pnand %p222_p13, %p216_p10 }
  0xa7   :  { %v74_v7 = vpop.xlane.xlu0 %73 }
  0xa8   :  { %v78_v8 = vsub.f32 %v57_v1, %v74_v7 }
  0xaa   :  { %v80_v9 = vmul.f32 1.442695, %v78_v8  ;;  %v94_v10 = vmul.f32 %v78_v8, %v59_v5 }
  0xab   :  { %v77_v11 = vpop.xlane.xlu0 %76 }
  0xac   :  { %163 = vpow2.f32 %v80_v9  ;;  %v79_v12 = vsub.f32 %v58_v2, %v77_v11  ;;  %v96_v13 = vsel %vm61_vm0, %v94_v10, 0.0 }
  0xad   :  { %97 = vadd.xlane.f32.xlu0 %v96_v13 }
  0xae   :  { %v82_v14 = vmul.f32 1.442695, %v79_v12  ;;  %v95_v21 = vmul.f32 %v79_v12, %v60_v19 }
  0xaf   :  { %v64_v23 = vpop.xlane.xlu0 %63 }
  0xb0   :  { %165 = vpow2.f32 %v82_v14  ;;  %v99_v22 = vsel %vm61_vm0, %v95_v21, 0.0  ;;  %vm68_vm1 = vcmp.ne.f32.partialorder %v64_v23, 0.0 }
  0xb1   :  { %v70_v25 = vsel %vm68_vm1, %v64_v23, 1.0 }
  0xb9   :  { %v164_v15 = vpop.eup %163 }
  0xba   :  { %v84_v16 = vsel %vm61_vm0, %v164_v15, 0.0 }
  0xbb   :  { %85 = vadd.xlane.f32.xlu1 %v84_v16 }
  0xbd   :  { %v166_v17 = vpop.eup %165 }
  0xbe   :  { %v87_v18 = vsel %vm61_vm0, %v166_v17, 0.0 }
  0xbf   :  { %88 = vadd.xlane.f32.xlu1 %v87_v18 }
  0xc3   :  { %66 = vadd.xlane.f32.xlu1 %v65_v20 }
  0xc7   :  { %100 = vadd.xlane.f32.xlu1 %v99_v22 }
 0x136   :  { %v98_v33 = vpop.xlane.xlu0 %97 }
 0x144   :  { %v86_v24 = vpop.xlane.xlu1 %85 }
 0x145   :  { %167 = vlog2.f32 %v86_v24 }
 0x148   :  { %v89_v26 = vpop.xlane.xlu1 %88 }
 0x149   :  { %169 = vlog2.f32 %v89_v26 }
 0x14a   :  { %171 = vrcp.f32 %v70_v25 }
 0x14c   :  { %v67_v27 = vpop.xlane.xlu1 %66 }
 0x14d   :  { %vm69_vm2 = vcmp.ne.f32.partialorder %v67_v27, 0.0 }
 0x14e   :  { %v71_v28 = vsel %vm69_vm2, %v67_v27, 1.0 }
 0x14f   :  { %173 = vrcp.f32 %v71_v28 }
 0x150   :  { %v101_v38 = vpop.xlane.xlu1 %100 }
 0x152   :  { %v168_v29 = vpop.eup %167 }
 0x153   :  { %v91_v30 = vmul.f32 0.6931472, %v168_v29 }
 0x155   :  { %v102_v31 = vmul.f32 %v91_v30, %v64_v23 }
 0x156   :  { %v170_v32 = vpop.eup %169 }
 0x157   :  { %v93_v34 = vmul.f32 0.6931472, %v170_v32  ;;  %v104_v35 = vsub.f32 %v102_v31, %v98_v33  ;;  %v172_v36 = vpop.eup %171 }
 0x159   :  { %v103_v37 = vmul.f32 %v93_v34, %v67_v27  ;;  %v107_v40 = vmul.f32 %v172_v36, %v104_v35 }
 0x15b   :  { %v105_v39 = vsub.f32 %v103_v37, %v101_v38  ;;  %v124_v43 = vsel %vm123_vm3, %v107_v40, 0.0 }
 0x15c   :  { %v174_v41 = vpop.eup %173 }
 0x15d   :  { %v109_v42 = vmul.f32 %v174_v41, %v105_v39 }
 0x15f   :  { %v125_v44 = vsel %vm123_vm3, %v109_v42, 0.0 }
 0x160   :  { %v126_v45 = vadd.f32 %v125_v44, %v124_v43 }
 0x162   :  { %127 = vadd.xlane.f32.xlu0 %v126_v45 }
 0x1eb   :  { %v128_v46 = vpop.xlane.xlu0 %127 }
 0x1ec   :  { %v129_v47 = vrot.slane %v128_v46, 4 }
 0x1ee   :  { %v130_v48 = vadd.f32 %v129_v47, %v128_v46 }
 0x1f0   :  { %v131_v49 = vrot.slane %v130_v48, 2 }
 0x1f2   :  { %v132_v50 = vadd.f32 %v131_v49, %v130_v48 }
 0x1f4   :  { %v133_v51 = vrot.slane %v132_v50, 1 }
 0x1f6   :  { %v134_v52 = vadd.f32 %v133_v51, %v132_v50 }
 0x1f8   :  { %155 = vpush %v134_v52 }
 0x229   :  { %s156_s21 = spop %155 }
 0x22a   :  { %v136_v54 = vstv %s156_s21 }
 0x22b   :  { %v137_v55 = vadd.f32 %v136_v54, %v122_v53 }
 0x22d   :  { %138 = vst [vmem:[#allocation7] sm:$0x1] %v137_v55 }
 0x22e   :  { %226 = shalt.err (!%p223_p0)
}
 0x22f   :  { %148 = dma.vmem_to_hbm [thread:$0]  %s146_s1, 16, %s281_s2, [#allocation4]  }
 0x230   :  { %239 = dma.done.wait [#allocation4], 16  }
 0x231   :  { %240 = vsyncadd [#allocation4], 4294967280 }
 0x232   :  { %152 = vsyncpa [#allocation3], 1 }
 0x233   :  { %153 = vsyncpa [#allocation6], 1 }
 0x234   :  { %154 = vsyncpa [#allocation4], 1 }

</bundles_post_ra>
